<compile_context>
chip_gen: v7x
topology: tpu7x:2x2x1
jax: 0.10.0
libtpu: 0.0.40
codegen_flags: <defaults>
</compile_context>

<pallas_src>
import math

import jax
import jax.numpy as jnp
from jax.experimental import pallas as pl
from jax.experimental.pallas import tpu as pltpu

_TARGET_BLOCK_BYTES = 2 * 1024 * 1024   # ~2 MiB per input block (safe on v5e/v6e/v7x)
_LANE_TILE_CAP = 8192                   # max lanes per block (wide unmasked stores)
_SMALL_INPUT_BYTES = 1 << 20            # below this, plain JAX beats a kernel launch


def _add_bias_kernel(x_ref, b_ref, o_ref):
    # b_ref is either a (1, TL) row (broadcast over sublanes) or a (TR, 1)
    # column (broadcast over lanes).  Promotion happens here so x is read from
    # HBM at its native width.
    o_ref[...] = x_ref[...].astype(o_ref.dtype) + b_ref[...]


def _round_down_mult(x, m):
    return (x // m) * m


def _round_up_mult(x, m):
    return -(-x // m) * m


def _sublane_multiple(*dtypes):
    # Native sublane packing: 8 rows for 4-byte, 16 for 2-byte, 32 for 1-byte.
    return max(max(8, 32 // jnp.dtype(d).itemsize) for d in dtypes)


def _lane_tile(lane_width):
    if lane_width <= _LANE_TILE_CAP:
        return lane_width                      # full extent: always legal
    best = _round_down_mult(_LANE_TILE_CAP, 128)
    for tl in range(best, 127, -128):          # prefer a divisor (no partial tile)
        if lane_width % tl == 0:
            return tl
    return best


def _row_tile(n_rows, lane_tile, itemsize, sub_mult):
    tr = _round_down_mult(
        max(sub_mult, _TARGET_BLOCK_BYTES // max(1, lane_tile * itemsize)), sub_mult
    )
    tr = max(sub_mult, tr)
    if n_rows >= 2 * sub_mult:
        # Keep >= 2 row blocks so the 'parallel' axis can shard across both
        # TensorCores on v7x even for medium inputs.
        tr = min(tr, _round_up_mult(pl.cdiv(n_rows, 2), sub_mult))
    if tr >= n_rows:
        tr = n_rows                            # full-extent block is always legal
    return tr


def _maybe_lane_fold(x2, b_row):
    """Fold rows into lanes when the lane width is not a multiple of 128."""
    r, l = x2.shape
    if l % 128 == 0:
        return x2, b_row
    k = 128 // math.gcd(l, 128)
    if k > 1 and r % k == 0:
        return x2.reshape(r // k, l * k), jnp.tile(b_row, (1, k))
    return x2, b_row


def _pallas_add(x2, b2, out_dtype, bias_is_row):
    r, l = x2.shape
    itemsize = max(jnp.dtype(x2.dtype).itemsize, jnp.dtype(out_dtype).itemsize)
    sub_mult = _sublane_multiple(x2.dtype, out_dtype)
    tl = _lane_tile(l)
    tr = _row_tile(r, tl, itemsize, sub_mult)
    grid = (pl.cdiv(r, tr), pl.cdiv(l, tl))

    if bias_is_row:
        b_spec = pl.BlockSpec((1, tl), lambda i, j: (0, j))
    else:
        b_spec = pl.BlockSpec((tr, 1), lambda i, j: (i, 0))

    return pl.pallas_call(
        _add_bias_kernel,
        out_shape=jax.ShapeDtypeStruct((r, l), out_dtype),
        grid=grid,
        in_specs=[pl.BlockSpec((tr, tl), lambda i, j: (i, j)), b_spec],
        out_specs=pl.BlockSpec((tr, tl), lambda i, j: (i, j)),
        compiler_params=pltpu.CompilerParams(
            dimension_semantics=("parallel", "parallel")
        ),
    )(x2, b2)


def add_bias(x, bias_param, *, force_pallas=False):
    """bias_param has shape (C, 1), matching nn.Parameter(bias.unsqueeze(1))."""
    bias_vec = bias_param.reshape(-1)
    out_dtype = jnp.result_type(x.dtype, bias_vec.dtype)
    x_bytes = x.size * jnp.dtype(x.dtype).itemsize

    if x.ndim == 2:
        n, c = x.shape
        if x_bytes < _SMALL_INPUT_BYTES and not force_pallas:
            return x + bias_vec.reshape(1, c)          # tiny: let XLA fuse it
        # NOTE: bias prep below is tiny; in a real module it would be hoisted
        # to parameter-setup time.
        b_row = bias_vec.astype(out_dtype).reshape(1, c)
        x2, b_row = _maybe_lane_fold(x, b_row)
        out = _pallas_add(x2, b_row, out_dtype, bias_is_row=True)
        return out.reshape(n, c)

    elif x.ndim == 4:
        n, c, h, w = x.shape
        hw = h * w
        if x_bytes < _SMALL_INPUT_BYTES and not force_pallas:
            return x + bias_vec.reshape(1, c, 1, 1)    # tiny: let XLA fuse it
        b = bias_vec.astype(out_dtype)
        if hw % 128 == 0:
            # Lane- and sublane-dense slab; bias becomes one column per row.
            x2 = x.reshape(n * c, hw)
            b_col = jnp.tile(b, n).reshape(n * c, 1)
            out = _pallas_add(x2, b_col, out_dtype, bias_is_row=False)
        else:
            # Small / odd H*W: fold channels (and spatial) onto the lane axis.
            x2 = x.reshape(n, c * hw)
            b_row = jnp.repeat(b, hw).reshape(1, c * hw)
            x2, b_row = _maybe_lane_fold(x2, b_row)
            out = _pallas_add(x2, b_row, out_dtype, bias_is_row=True)
        return out.reshape(n, c, h, w)

    else:
        raise ValueError(f"AddBias expects 2-D or 4-D input, got ndim={x.ndim}")


if __name__ == "__main__":
    key = jax.random.PRNGKey(0)
    k1, k2, k3, k4 = jax.random.split(key, 4)

    # Deterministic "parameter": bias vector of length C, stored as (C, 1)
    # exactly like nn.Parameter(bias.unsqueeze(1)).
    C = 4
    bias_vec = jax.random.normal(k1, (C,), dtype=jnp.float32)
    bias_param = bias_vec[:, None]                     # (C, 1)

    # 4-D case (NCHW feature map, H*W multiple of 128 -> column-bias layout).
    x4 = jax.random.normal(k2, (2, C, 16, 16), dtype=jnp.float32)
    y4 = jax.block_until_ready(add_bias(x4, bias_param, force_pallas=True))
    ref4 = x4 + bias_vec.reshape(1, C, 1, 1)
    assert y4.shape == x4.shape and y4.dtype == x4.dtype
    assert jnp.allclose(y4, ref4, atol=1e-6), "4-D AddBias mismatch"

    # 2-D case (N, C) — e.g. action-mean head.
    C2 = 32
    bias_vec2 = jax.random.normal(k1, (C2,), dtype=jnp.float32)
    bias_param2 = bias_vec2[:, None]
    x2 = jax.random.normal(k3, (2, C2), dtype=jnp.float32)
    y2 = jax.block_until_ready(add_bias(x2, bias_param2, force_pallas=True))
    ref2 = x2 + bias_vec2.reshape(1, C2)
    assert y2.shape == x2.shape and y2.dtype == x2.dtype
    assert jnp.allclose(y2, ref2, atol=1e-6), "2-D AddBias mismatch"

    # Odd H*W (20x20): channels folded onto lanes.
    xl4 = jax.random.normal(k2, (3, C, 20, 20), dtype=jnp.float32)
    yl4 = jax.block_until_ready(add_bias(xl4, bias_param, force_pallas=True))
    assert jnp.allclose(yl4, xl4 + bias_vec.reshape(1, C, 1, 1), atol=1e-6)

    # 2-D with non-128 C and foldable N (exercises row->lane fold + row tiling).
    xl2 = jax.random.normal(k3, (520, C2), dtype=jnp.float32)
    yl2 = jax.block_until_ready(add_bias(xl2, bias_param2, force_pallas=True))
    assert jnp.allclose(yl2, xl2 + bias_vec2.reshape(1, C2), atol=1e-6)

    # Mixed dtypes: bf16 activations + f32 bias -> in-kernel promotion to f32.
    xb = jax.random.normal(k4, (16, 256), dtype=jnp.bfloat16)
    bias_vec3 = jax.random.normal(k1, (256,), dtype=jnp.float32)
    yb = jax.block_until_ready(add_bias(xb, bias_vec3[:, None], force_pallas=True))
    refb = xb.astype(jnp.float32) + bias_vec3.reshape(1, 256)
    assert yb.dtype == jnp.float32
    assert jnp.allclose(yb, refb, atol=1e-6), "mixed-dtype AddBias mismatch"

    # A moderately sized 4-D input (> 1 MiB) that takes the natural Pallas path
    # with a multi-block 'parallel' grid.
    xm4 = jax.random.normal(k2, (128, C, 32, 32), dtype=jnp.float32)
    ym4 = jax.block_until_ready(add_bias(xm4, bias_param))
    assert jnp.allclose(ym4, xm4 + bias_vec.reshape(1, C, 1, 1), atol=1e-6)

    print("KERNEL_OK")
</pallas_src>

<mosaic_0001>
module attributes {stable_mosaic.version = 11 : i64} {
  func.func @_add_bias_kernel(%arg0: i32, %arg1: i32, %arg2: memref<8x256xf32, #tpu.memory_space<vmem>>, %arg3: memref<8x1xf32, #tpu.memory_space<vmem>>, %arg4: memref<8x256xf32, #tpu.memory_space<vmem>>) attributes {dimension_semantics = [#tpu.dimension_semantics<parallel>, #tpu.dimension_semantics<parallel>], iteration_bounds = array<i64: 1, 1>, scalar_prefetch = 0 : i64, scratch_operands = 0 : i64, tpu.core_type = #tpu.core_type<tc>, window_params = [{transform_indices = @transform_0, window_bounds = array<i64: 8, 256>}, {transform_indices = @transform_1, window_bounds = array<i64: 8, 1>}, {transform_indices = @transform_2, window_bounds = array<i64: 8, 256>}]} {
    %c0 = arith.constant 0 : index
    %c0_0 = arith.constant 0 : index
    %0 = vector.load %arg2[%c0, %c0_0] : memref<8x256xf32, #tpu.memory_space<vmem>>, vector<8x256xf32>
    %c0_1 = arith.constant 0 : index
    %c0_2 = arith.constant 0 : index
    %1 = vector.load %arg3[%c0_1, %c0_2] : memref<8x1xf32, #tpu.memory_space<vmem>>, vector<8x1xf32>
    %2 = vector.broadcast %1 : vector<8x1xf32> to vector<8x256xf32>
    %3 = arith.addf %0, %2 : vector<8x256xf32>
    %c0_3 = arith.constant 0 : index
    %c0_4 = arith.constant 0 : index
    %4 = vector.load %arg4[%c0_3, %c0_4] : memref<8x256xf32, #tpu.memory_space<vmem>>, vector<8x256xf32>
    tpu.vector_store %arg4[%c0_3, %c0_4], %3 {strides = array<i32>} : memref<8x256xf32, #tpu.memory_space<vmem>>, vector<8x256xf32>,
    return
  }
  func.func @transform_0(%arg0: i32, %arg1: i32) -> (i32, i32) {
    %c0_i32 = arith.constant 0 : i32
    return %arg0, %arg1 : i32, i32
  }
  func.func @transform_1(%arg0: i32, %arg1: i32) -> (i32, i32) {
    %c0_i32 = arith.constant 0 : i32
    %c0_i32_0 = arith.constant 0 : i32
    return %arg0, %c0_i32 : i32, i32
  }
  func.func @transform_2(%arg0: i32, %arg1: i32) -> (i32, i32) {
    %c0_i32 = arith.constant 0 : i32
    return %arg0, %arg1 : i32, i32
  }
}

</mosaic_0001>

<bundles_post_ra>
// kernel: tpu_custom_call.1
= control target key start
LH: loop header
LB: loop body
LE: loop exit
PB: predicated region body
PF: predicated region fallthrough
CT: control target
= control target key end

     0   :  { %7 = vsyncpa [#allocation3], 0  ;;  %s148_s0 = inlined_call_operand.hbm [shape: f32[8,256], index: 0, kind: input, shape index: {}]   ;;  %s149_s1 = inlined_call_operand.vmem [shape: f32[8,1], index: 1, kind: input, shape index: {}]   ;;  %s150_s2 = inlined_call_operand.hbm [shape: f32[8,256], index: 2, kind: output, shape index: {}]  }
   0x1   :  { %8 = vsyncpa [#allocation4], 0  ;;  %s103_s9 = smov [#allocation2]   ;;  %s55_s13 = scalar_lea.hbm %s148_s0, 256 }
   0x2   :  { %s15_s10 = sshll.u32 %s103_s9, 4  ;;  %p56_p0 = scmp.ne.s32.totalorder %s148_s0, %s55_s13  ;;  %s16_s10 = int_to_ptr.vmem [resolvable:$true] %s15_s10 }
   0x3   :  { %p59_p1 = scmp.lt.u32.totalorder %s55_s13, %s148_s0 }
   0x5   :  { %p61_p2 = pnand %p59_p1, %p56_p0 }
   0x7   :  { %64 = shalt.err (!%p61_p2)
}
   0x8   :  { %s65_s18 = scalar_lea.vmem %s16_s10, 256  ;;  %p70_p4 = scmp.lt.s32.totalorder %s16_s10, %s16_s10 }
   0x9   :  { %p66_p3 = scmp.ne.s32.totalorder %s16_s10, %s65_s18  ;;  %p71_p5 = scmp.lt.s32.totalorder %s65_s18, %s65_s18 }
   0xb   :  { %p72_p6 = por %p71_p5, %p70_p4 }
   0xd   :  { %p73_p7 = pnand %p72_p6, %p66_p3 }
   0xf   :  { %76 = shalt.err (!%p73_p7)
}
  0x10   :  { %18 = dma.hbm_to_vmem [thread:$0]  %s148_s0, 256, %s16_s10, [#allocation3]  }
  0x11   :  { %99 = dma.done.wait [#allocation3], 256  }
  0x12   :  { %100 = vsyncadd [#allocation3], 4294967040  ;;  %v104_v0 = vmov 0   ;;  %v26_v1 = vld [vmem:[%s149_s1] sm:$0xff]  ;;  %v25_v3 = vld [vmem:[#allocation2 + $0x8] sm:$0xff]  ;;  %s105_s23 = smov [#allocation5]  }
  0x13   :  { %54 = vset.pattern.permute.xlu0 %v104_v0  ;;  %v24_v2 = vld [vmem:[#allocation2] sm:$0xff]  ;;  %s42_s24 = sshll.u32 %s105_s23, 4  ;;  %s43_s24 = int_to_ptr.vmem [resolvable:$true] %s42_s24 }
  0x14   :  { %29 = vperm.xlu0 %54, %v26_v1   ;;  %s77_s0 = scalar_lea.vmem %s43_s24, 256  ;;  %p82_p9 = scmp.lt.s32.totalorder %s43_s24, %s43_s24 }
  0x15   :  { %p78_p8 = scmp.ne.s32.totalorder %s43_s24, %s77_s0  ;;  %p83_p10 = scmp.lt.s32.totalorder %s77_s0, %s77_s0 }
  0x17   :  { %p84_p11 = por %p83_p10, %p82_p9 }
  0x19   :  { %p85_p12 = pnand %p84_p11, %p78_p8 }
  0x93   :  { %v30_v4 = vpop.permute.xlu0 %29 }
  0x94   :  { %v32_v5 = vadd.f32 %v30_v4, %v24_v2  ;;  %v33_v6 = vadd.f32 %v30_v4, %v25_v3 }
  0x96   :  { %34 = vst [vmem:[#allocation5] sm:$0xff] %v32_v5  ;;  %35 = vst [vmem:[#allocation5 + $0x8] sm:$0xff] %v33_v6 }
  0x97   :  { %88 = shalt.err (!%p85_p12)
}
  0x98   :  { %s89_s26 = scalar_lea.hbm %s150_s2, 256 }
  0x99   :  { %p90_p13 = scmp.ne.s32.totalorder %s150_s2, %s89_s26  ;;  %p93_p0 = scmp.lt.u32.totalorder %s89_s26, %s150_s2 }
  0x9b   :  { %p95_p1 = pnand %p93_p0, %p90_p13 }
  0x9d   :  { %98 = shalt.err (!%p95_p1)
}
  0x9e   :  { %45 = dma.vmem_to_hbm [thread:$0]  %s43_s24, 256, %s150_s2, [#allocation4]  }
  0x9f   :  { %101 = dma.done.wait [#allocation4], 256  }
  0xa0   :  { %102 = vsyncadd [#allocation4], 4294967040 }
  0xa1   :  { %49 = vsyncpa [#allocation3], 1 }
  0xa2   :  { %50 = vsyncpa [#allocation4], 1 }

</bundles_post_ra>
